<compile_context>
chip_gen: v7x
topology: tpu7x:2x2x1
jax: 0.10.0
libtpu: 0.0.40
codegen_flags: <defaults>
</compile_context>

<pallas_src>
import jax
import jax.numpy as jnp
from jax.experimental import pallas as pl
from jax.experimental.pallas import tpu as pltpu


def vae_forward_kernel(x_ref, w1_ref, b1_ref, w23_ref, b23_ref,
                       wd1_ref, bd1_ref, wd2_ref, bd2_ref, eps_ref,
                       meanvar_ref, recon_ref, h2_ref):
    TB = x_ref.shape[0]          # batch tile
    L = wd1_ref.shape[0]         # latent dim
    S = eps_ref.shape[0]         # noise samples
    D = wd2_ref.shape[1]         # input/output dim
    f32, bf16 = jnp.float32, jnp.bfloat16

    # ---- encoder fc1: bf16 operands on MXU, f32 accumulate, f32 tanh ----
    h = jnp.tanh(
        jnp.dot(x_ref[...].astype(bf16), w1_ref[...],
                preferred_element_type=f32) + b1_ref[...])

    # ---- fused mean || logvar projection (f32, N = 2L is tiny) ----
    mv = jnp.dot(h, w23_ref[...], preferred_element_type=f32) + b23_ref[...]
    mean = mv[:, :L]                       # (TB, L)
    var = jnp.exp(mv[:, L:])               # (TB, L), exp evaluated exactly once
    meanvar_ref[...] = jnp.concatenate([mean, var], axis=-1)

    # ---- decoder fc1 (contraction depth = L, tiny) on the VPU ----
    # wd1 row reads hoisted out of the per-sample loop.
    wd1_rows = [wd1_ref[l:l + 1, :] for l in range(L)]      # each (1, H) f32

    # sample-independent part: base = mean @ Wd1 + bd1
    base = bd1_ref[...]
    for l in range(L):
        base = base + mean[:, l:l + 1] * wd1_rows[l]

    # per-sample: pre = base + (var * eps_s) @ Wd1 ; ReLU ; stage as bf16
    for s in range(S):
        coef = var * eps_ref[s]                              # (TB, L)
        pre = base
        for l in range(L):
            pre = pre + coef[:, l:l + 1] * wd1_rows[l]
        h2_ref[s * TB:(s + 1) * TB, :] = jnp.maximum(pre, 0.0).astype(bf16)

    # ---- decoder fc2: a single batched MXU pass over all S samples ----
    logits = jnp.dot(h2_ref[...], wd2_ref[...],
                     preferred_element_type=f32) + bd2_ref[...]   # (S*TB, D)

    # per-sample sigmoid + direct lane-dense slab stores (D multiple of 128)
    for s in range(S):
        y_s = jax.nn.sigmoid(logits[s * TB:(s + 1) * TB, :])
        recon_ref[:, s * D:(s + 1) * D] = y_s.astype(recon_ref.dtype)


def _pick_batch_tile(B, cap=512):
    """Largest tile (multiple of 8) dividing B, <= cap; when B >= 16 also keep
    >= 2 grid steps so v7x megacore can shard the batch axis."""
    cap = min(cap, B)
    if B >= 16:
        half = ((-(-B // 2)) + 7) // 8 * 8          # ~B/2 rounded up to mult of 8
        cap = min(cap, half)
    tb = (cap // 8) * 8
    while tb >= 8 and B % tb != 0:
        tb -= 8
    if tb < 8 or B % tb != 0:
        tb = B                                      # fallback: full-dim block
    return tb


def autoencoder_forward(x, params, eps):
    """x: (B, D) f32; eps: (S, B, L) f32.
    params: PyTorch Linear weights pre-transposed to (in, out), biases (1, out).
    Returns (mean f32, var f32, recon bf16) with recon shaped (B, S, D)."""
    B, D = x.shape
    S, _, L = eps.shape
    H = params["b1"].shape[-1]

    TB = _pick_batch_tile(B)
    assert B % TB == 0

    f32, bf16 = jnp.float32, jnp.bfloat16

    # bf16 weights for the big MXU matmuls; small mean/logvar head stays f32
    # (removes bf16 error that exp() would amplify, at zero cost); decoder fc1
    # weight stays f32 (VPU path).
    w1 = params["w1"].astype(bf16)
    w23 = jnp.concatenate([params["w2"], params["w3"]], axis=1).astype(f32)
    b23 = jnp.concatenate([params["b2"], params["b3"]], axis=1).astype(f32)
    wd1 = params["wd1"].astype(f32)
    wd2 = params["wd2"].astype(bf16)
    b1, bd1, bd2 = params["b1"], params["bd1"], params["bd2"]

    grid = (B // TB,)
    const2 = lambda i: (0, 0)

    in_specs = [
        pl.BlockSpec((TB, D), lambda i: (i, 0)),          # x
        pl.BlockSpec((D, H), const2),                     # w1   (bf16)
        pl.BlockSpec((1, H), const2),                     # b1
        pl.BlockSpec((H, 2 * L), const2),                 # w2||w3 (f32, tiny)
        pl.BlockSpec((1, 2 * L), const2),                 # b2||b3
        pl.BlockSpec((L, H), const2),                     # wd1  (f32, VPU)
        pl.BlockSpec((1, H), const2),                     # bd1
        pl.BlockSpec((H, D), const2),                     # wd2  (bf16)
        pl.BlockSpec((1, D), const2),                     # bd2
        pl.BlockSpec((S, TB, L), lambda i: (0, i, 0)),    # eps
    ]
    out_specs = (
        pl.BlockSpec((TB, 2 * L), lambda i: (i, 0)),      # mean || var (f32)
        pl.BlockSpec((TB, S * D), lambda i: (i, 0)),      # recon, lane-dense bf16
    )
    out_shape = (
        jax.ShapeDtypeStruct((B, 2 * L), f32),
        jax.ShapeDtypeStruct((B, S * D), bf16),
    )

    flops = 2 * B * D * H + 2 * B * H * (2 * L) + 2 * S * B * (L * H + H * D)
    transcendentals = B * H + B * L + S * B * D           # tanh, exp, sigmoid
    bytes_accessed = (
        2 * (w1.size + wd2.size) + 4 * (w23.size + wd1.size)
        + 4 * (b1.size + b23.size + bd1.size + bd2.size)
        + 4 * (x.size + eps.size + B * 2 * L) + 2 * B * S * D)

    meanvar, recon2d = pl.pallas_call(
        vae_forward_kernel,
        out_shape=out_shape,
        grid_spec=pltpu.PrefetchScalarGridSpec(
            num_scalar_prefetch=0,
            grid=grid,
            in_specs=in_specs,
            out_specs=out_specs,
            scratch_shapes=[pltpu.VMEM((S * TB, H), bf16)],   # staged ReLU blocks
        ),
        compiler_params=pltpu.CompilerParams(
            dimension_semantics=("parallel",),
            vmem_limit_bytes=32 * 1024 * 1024),
        cost_estimate=pl.CostEstimate(
            flops=flops, transcendentals=transcendentals,
            bytes_accessed=bytes_accessed),
    )(x, w1, b1, w23, b23, wd1, bd1, wd2, bd2, eps)

    mean = meanvar[:, :L]
    var = meanvar[:, L:]
    recon = recon2d.reshape(B, S, D)     # free reshape == torch.stack(outs, dim=1)
    return mean, var, recon


def init_params(key, input_dim, latent_dim, hidden=512):
    """Deterministic init mimicking torch.nn.Linear (uniform +-1/sqrt(fan_in)).
    Weights stored pre-transposed as (in, out); biases as (1, out)."""
    def linear(k, fan_in, fan_out):
        kw, kb = jax.random.split(k)
        bound = 1.0 / jnp.sqrt(fan_in)
        w = jax.random.uniform(kw, (fan_in, fan_out), jnp.float32, -bound, bound)
        b = jax.random.uniform(kb, (1, fan_out), jnp.float32, -bound, bound)
        return w, b

    k1, k2, k3, k4, k5 = jax.random.split(key, 5)
    w1, b1 = linear(k1, input_dim, hidden)     # enc_fc1
    w2, b2 = linear(k2, hidden, latent_dim)    # enc_fc2
    w3, b3 = linear(k3, hidden, latent_dim)    # enc_fc3
    wd1, bd1 = linear(k4, latent_dim, hidden)  # dec_fc1
    wd2, bd2 = linear(k5, hidden, input_dim)   # dec_fc2
    return dict(w1=w1, b1=b1, w2=w2, b2=b2, w3=w3, b3=b3,
                wd1=wd1, bd1=bd1, wd2=wd2, bd2=bd2)


def reference_forward(x, params, eps, mixed=False):
    """Pure-JAX reference. mixed=True mirrors the kernel recipe (bf16 operands
    for enc_fc1 / dec_fc2 matmuls, f32 mean/logvar head, f32 elementwise);
    mixed=False is the original full-f32 semantics."""
    f32 = jnp.float32

    def mm(a, b, low_precision):
        if mixed and low_precision:
            a, b = a.astype(jnp.bfloat16), b.astype(jnp.bfloat16)
        return jnp.dot(a, b, preferred_element_type=f32)

    h = jnp.tanh(mm(x, params["w1"], True) + params["b1"])
    mean = mm(h, params["w2"], False) + params["b2"]
    var = jnp.exp(mm(h, params["w3"], False) + params["b3"])
    outs = []
    for s in range(eps.shape[0]):
        z = mean + var * eps[s]
        h2 = jnp.maximum(z @ params["wd1"] + params["bd1"], 0.0)   # f32, K=latent
        outs.append(jax.nn.sigmoid(mm(h2, params["wd2"], True) + params["bd2"]))
    return mean, var, jnp.stack(outs, axis=1)


if __name__ == "__main__":
    B, INPUT_DIM, LATENT_DIM, NUM_NOISE = 8, 256, 2, 2

    key = jax.random.PRNGKey(0)
    kx, keps, kp = jax.random.split(key, 3)

    x = jax.random.normal(kx, (B, INPUT_DIM), jnp.float32)
    eps = jax.random.normal(keps, (NUM_NOISE, B, LATENT_DIM), jnp.float32)
    params = init_params(kp, INPUT_DIM, LATENT_DIM)

    mean, var, recon = jax.block_until_ready(autoencoder_forward(x, params, eps))

    assert mean.shape == (B, LATENT_DIM)
    assert var.shape == (B, LATENT_DIM)
    assert recon.shape == (B, NUM_NOISE, INPUT_DIM)

    # exact-recipe check: reference with the same mixed-precision matmuls
    mean_m, var_m, recon_m = reference_forward(x, params, eps, mixed=True)
    assert jnp.allclose(mean, mean_m, atol=2e-3, rtol=2e-3)
    assert jnp.allclose(var, var_m, atol=2e-3, rtol=2e-3)
    # recon is emitted in bf16 -> tolerance covers the bf16 quantization step
    assert jnp.allclose(recon.astype(jnp.float32), recon_m, atol=1.5e-2)

    # semantic sanity check vs the full-f32 reference (loose tol: bf16 weights)
    mean_f, var_f, recon_f = reference_forward(x, params, eps, mixed=False)
    assert jnp.allclose(mean, mean_f, atol=5e-2, rtol=5e-2)
    assert jnp.allclose(var, var_f, atol=5e-2, rtol=5e-2)
    assert jnp.allclose(recon.astype(jnp.float32), recon_f, atol=5e-2)

    print("KERNEL_OK")
</pallas_src>

<mosaic_0001>
module attributes {stable_mosaic.version = 11 : i64} {
  func.func @vae_forward_kernel(%arg0: i32, %arg1: memref<8x256xf32, #tpu.memory_space<vmem>>, %arg2: memref<256x512xbf16, #tpu.memory_space<vmem>>, %arg3: memref<1x512xf32, #tpu.memory_space<vmem>>, %arg4: memref<512x4xf32, #tpu.memory_space<vmem>>, %arg5: memref<1x4xf32, #tpu.memory_space<vmem>>, %arg6: memref<2x512xf32, #tpu.memory_space<vmem>>, %arg7: memref<1x512xf32, #tpu.memory_space<vmem>>, %arg8: memref<512x256xbf16, #tpu.memory_space<vmem>>, %arg9: memref<1x256xf32, #tpu.memory_space<vmem>>, %arg10: memref<2x8x2xf32, #tpu.memory_space<vmem>>, %arg11: memref<8x4xf32, #tpu.memory_space<vmem>>, %arg12: memref<8x512xbf16, #tpu.memory_space<vmem>>, %arg13: memref<16x512xbf16, #tpu.memory_space<vmem>>) attributes {dimension_semantics = [#tpu.dimension_semantics<parallel>], iteration_bounds = array<i64: 1>, scalar_prefetch = 0 : i64, scratch_operands = 1 : i64, tpu.core_type = #tpu.core_type<tc>, window_params = [{transform_indices = @transform_0, window_bounds = array<i64: 8, 256>}, {pipeline_mode = #tpu.pipeline_mode<synchronous>, transform_indices = @transform_1, window_bounds = array<i64: 256, 512>}, {pipeline_mode = #tpu.pipeline_mode<synchronous>, transform_indices = @transform_2, window_bounds = array<i64: 1, 512>}, {pipeline_mode = #tpu.pipeline_mode<synchronous>, transform_indices = @transform_3, window_bounds = array<i64: 512, 4>}, {pipeline_mode = #tpu.pipeline_mode<synchronous>, transform_indices = @transform_4, window_bounds = array<i64: 1, 4>}, {pipeline_mode = #tpu.pipeline_mode<synchronous>, transform_indices = @transform_5, window_bounds = array<i64: 2, 512>}, {pipeline_mode = #tpu.pipeline_mode<synchronous>, transform_indices = @transform_6, window_bounds = array<i64: 1, 512>}, {pipeline_mode = #tpu.pipeline_mode<synchronous>, transform_indices = @transform_7, window_bounds = array<i64: 512, 256>}, {pipeline_mode = #tpu.pipeline_mode<synchronous>, transform_indices = @transform_8, window_bounds = array<i64: 1, 256>}, {transform_indices = @transform_9, window_bounds = array<i64: 2, 8, 2>}, {transform_indices = @transform_10, window_bounds = array<i64: 8, 4>}, {transform_indices = @transform_11, window_bounds = array<i64: 8, 512>}]} {
    %c0 = arith.constant 0 : index
    %c0_0 = arith.constant 0 : index
    %0 = vector.load %arg1[%c0, %c0_0] : memref<8x256xf32, #tpu.memory_space<vmem>>, vector<8x256xf32>
    %1 = arith.truncf %0 : vector<8x256xf32> to vector<8x256xbf16>
    %c0_1 = arith.constant 0 : index
    %c0_2 = arith.constant 0 : index
    %2 = vector.load %arg2[%c0_1, %c0_2] : memref<256x512xbf16, #tpu.memory_space<vmem>>, vector<256x512xbf16>
    %cst = arith.constant dense<0.000000e+00> : vector<8x512xf32>
    %3 = tpu.matmul %1, %2, %cst {dimension_numbers = #tpu.dot_dimension_numbers<[1], [0], [0], [1], [0, 0, 1, 1], [], []>} : vector<8x256xbf16>, vector<256x512xbf16>, vector<8x512xf32> -> vector<8x512xf32>
    %c0_3 = arith.constant 0 : index
    %c0_4 = arith.constant 0 : index
    %4 = vector.load %arg3[%c0_3, %c0_4] : memref<1x512xf32, #tpu.memory_space<vmem>>, vector<1x512xf32>
    %5 = vector.broadcast %4 : vector<1x512xf32> to vector<8x512xf32>
    %6 = arith.addf %3, %5 : vector<8x512xf32>
    %7 = math.tanh %6 : vector<8x512xf32>
    %c0_5 = arith.constant 0 : index
    %c0_6 = arith.constant 0 : index
    %8 = vector.load %arg4[%c0_5, %c0_6] : memref<512x4xf32, #tpu.memory_space<vmem>>, vector<512x4xf32>
    %cst_7 = arith.constant dense<0.000000e+00> : vector<8x4xf32>
    %9 = tpu.matmul %7, %8, %cst_7 {dimension_numbers = #tpu.dot_dimension_numbers<[1], [0], [0], [1], [0, 0, 1, 1], [], []>} : vector<8x512xf32>, vector<512x4xf32>, vector<8x4xf32> -> vector<8x4xf32>
    %c0_8 = arith.constant 0 : index
    %c0_9 = arith.constant 0 : index
    %10 = vector.load %arg5[%c0_8, %c0_9] : memref<1x4xf32, #tpu.memory_space<vmem>>, vector<1x4xf32>
    %11 = vector.broadcast %10 : vector<1x4xf32> to vector<8x4xf32>
    %12 = arith.addf %9, %11 : vector<8x4xf32>
    %13 = vector.extract_strided_slice %12 {offsets = [0, 0], sizes = [8, 2], strides = [1, 1]} : vector<8x4xf32> to vector<8x2xf32>
    %14 = vector.extract_strided_slice %12 {offsets = [0, 2], sizes = [8, 2], strides = [1, 1]} : vector<8x4xf32> to vector<8x2xf32>
    %15 = math.exp %14 : vector<8x2xf32>
    %16 = tpu.concatenate %13, %15 in 1 : vector<8x2xf32>, vector<8x2xf32> -> vector<8x4xf32>
    %c0_10 = arith.constant 0 : index
    %c0_11 = arith.constant 0 : index
    %17 = vector.load %arg11[%c0_10, %c0_11] : memref<8x4xf32, #tpu.memory_space<vmem>>, vector<8x4xf32>
    tpu.vector_store %arg11[%c0_10, %c0_11], %16 {strides = array<i32>} : memref<8x4xf32, #tpu.memory_space<vmem>>, vector<8x4xf32>,
    %c0_12 = arith.constant 0 : index
    %c0_13 = arith.constant 0 : index
    %18 = vector.load %arg6[%c0_12, %c0_13] : memref<2x512xf32, #tpu.memory_space<vmem>>, vector<1x512xf32>
    %c1 = arith.constant 1 : index
    %c0_14 = arith.constant 0 : index
    %19 = vector.load %arg6[%c1, %c0_14] : memref<2x512xf32, #tpu.memory_space<vmem>>, vector<1x512xf32>
    %c0_15 = arith.constant 0 : index
    %c0_16 = arith.constant 0 : index
    %20 = vector.load %arg7[%c0_15, %c0_16] : memref<1x512xf32, #tpu.memory_space<vmem>>, vector<1x512xf32>
    %21 = vector.extract_strided_slice %13 {offsets = [0, 0], sizes = [8, 1], strides = [1, 1]} : vector<8x2xf32> to vector<8x1xf32>
    %22 = vector.broadcast %21 : vector<8x1xf32> to vector<8x512xf32>
    %23 = vector.broadcast %18 : vector<1x512xf32> to vector<8x512xf32>
    %24 = arith.mulf %22, %23 : vector<8x512xf32>
    %25 = vector.broadcast %20 : vector<1x512xf32> to vector<8x512xf32>
    %26 = arith.addf %25, %24 : vector<8x512xf32>
    %27 = vector.extract_strided_slice %13 {offsets = [0, 1], sizes = [8, 1], strides = [1, 1]} : vector<8x2xf32> to vector<8x1xf32>
    %28 = vector.broadcast %27 : vector<8x1xf32> to vector<8x512xf32>
    %29 = vector.broadcast %19 : vector<1x512xf32> to vector<8x512xf32>
    %30 = arith.mulf %28, %29 : vector<8x512xf32>
    %31 = arith.addf %26, %30 : vector<8x512xf32>
    %c0_17 = arith.constant 0 : index
    %c0_18 = arith.constant 0 : index
    %c0_19 = arith.constant 0 : index
    %32 = vector.load %arg10[%c0_17, %c0_18, %c0_19] : memref<2x8x2xf32, #tpu.memory_space<vmem>>, vector<1x8x2xf32>
    %33 = vector.shape_cast %32 : vector<1x8x2xf32> to vector<8x2xf32>
    %34 = arith.mulf %15, %33 : vector<8x2xf32>
    %35 = vector.extract_strided_slice %34 {offsets = [0, 0], sizes = [8, 1], strides = [1, 1]} : vector<8x2xf32> to vector<8x1xf32>
    %36 = vector.broadcast %35 : vector<8x1xf32> to vector<8x512xf32>
    %37 = vector.broadcast %18 : vector<1x512xf32> to vector<8x512xf32>
    %38 = arith.mulf %36, %37 : vector<8x512xf32>
    %39 = arith.addf %31, %38 : vector<8x512xf32>
    %40 = vector.extract_strided_slice %34 {offsets = [0, 1], sizes = [8, 1], strides = [1, 1]} : vector<8x2xf32> to vector<8x1xf32>
    %41 = vector.broadcast %40 : vector<8x1xf32> to vector<8x512xf32>
    %42 = vector.broadcast %19 : vector<1x512xf32> to vector<8x512xf32>
    %43 = arith.mulf %41, %42 : vector<8x512xf32>
    %44 = arith.addf %39, %43 : vector<8x512xf32>
    %cst_20 = arith.constant 0.000000e+00 : f32
    %45 = vector.broadcast %cst_20 : f32 to vector<8x512xf32>
    %46 = arith.maximumf %44, %45 : vector<8x512xf32>
    %47 = arith.truncf %46 : vector<8x512xf32> to vector<8x512xbf16>
    %c0_21 = arith.constant 0 : index
    %c0_22 = arith.constant 0 : index
    %48 = vector.load %arg13[%c0_21, %c0_22] : memref<16x512xbf16, #tpu.memory_space<vmem>>, vector<8x512xbf16>
    tpu.vector_store %arg13[%c0_21, %c0_22], %47 {strides = array<i32>} : memref<16x512xbf16, #tpu.memory_space<vmem>>, vector<8x512xbf16>,
    %c1_23 = arith.constant 1 : index
    %c0_24 = arith.constant 0 : index
    %c0_25 = arith.constant 0 : index
    %49 = vector.load %arg10[%c1_23, %c0_24, %c0_25] : memref<2x8x2xf32, #tpu.memory_space<vmem>>, vector<1x8x2xf32>
    %50 = vector.shape_cast %49 : vector<1x8x2xf32> to vector<8x2xf32>
    %51 = arith.mulf %15, %50 : vector<8x2xf32>
    %52 = vector.extract_strided_slice %51 {offsets = [0, 0], sizes = [8, 1], strides = [1, 1]} : vector<8x2xf32> to vector<8x1xf32>
    %53 = vector.broadcast %52 : vector<8x1xf32> to vector<8x512xf32>
    %54 = vector.broadcast %18 : vector<1x512xf32> to vector<8x512xf32>
    %55 = arith.mulf %53, %54 : vector<8x512xf32>
    %56 = arith.addf %31, %55 : vector<8x512xf32>
    %57 = vector.extract_strided_slice %51 {offsets = [0, 1], sizes = [8, 1], strides = [1, 1]} : vector<8x2xf32> to vector<8x1xf32>
    %58 = vector.broadcast %57 : vector<8x1xf32> to vector<8x512xf32>
    %59 = vector.broadcast %19 : vector<1x512xf32> to vector<8x512xf32>
    %60 = arith.mulf %58, %59 : vector<8x512xf32>
    %61 = arith.addf %56, %60 : vector<8x512xf32>
    %cst_26 = arith.constant 0.000000e+00 : f32
    %62 = vector.broadcast %cst_26 : f32 to vector<8x512xf32>
    %63 = arith.maximumf %61, %62 : vector<8x512xf32>
    %64 = arith.truncf %63 : vector<8x512xf32> to vector<8x512xbf16>
    %c8 = arith.constant 8 : index
    %c0_27 = arith.constant 0 : index
    %65 = vector.load %arg13[%c8, %c0_27] : memref<16x512xbf16, #tpu.memory_space<vmem>>, vector<8x512xbf16>
    tpu.vector_store %arg13[%c8, %c0_27], %64 {strides = array<i32>} : memref<16x512xbf16, #tpu.memory_space<vmem>>, vector<8x512xbf16>,
    %c0_28 = arith.constant 0 : index
    %c0_29 = arith.constant 0 : index
    %66 = vector.load %arg13[%c0_28, %c0_29] : memref<16x512xbf16, #tpu.memory_space<vmem>>, vector<16x512xbf16>
    %c0_30 = arith.constant 0 : index
    %c0_31 = arith.constant 0 : index
    %67 = vector.load %arg8[%c0_30, %c0_31] : memref<512x256xbf16, #tpu.memory_space<vmem>>, vector<512x256xbf16>
    %cst_32 = arith.constant dense<0.000000e+00> : vector<16x256xf32>
    %68 = tpu.matmul %66, %67, %cst_32 {dimension_numbers = #tpu.dot_dimension_numbers<[1], [0], [0], [1], [0, 0, 1, 1], [], []>} : vector<16x512xbf16>, vector<512x256xbf16>, vector<16x256xf32> -> vector<16x256xf32>
    %c0_33 = arith.constant 0 : index
    %c0_34 = arith.constant 0 : index
    %69 = vector.load %arg9[%c0_33, %c0_34] : memref<1x256xf32, #tpu.memory_space<vmem>>, vector<1x256xf32>
    %70 = vector.broadcast %69 : vector<1x256xf32> to vector<16x256xf32>
    %71 = arith.addf %68, %70 : vector<16x256xf32>
    %72 = vector.extract_strided_slice %71 {offsets = [0, 0], sizes = [8, 256], strides = [1, 1]} : vector<16x256xf32> to vector<8x256xf32>
    %73 = arith.negf %72 : vector<8x256xf32>
    %74 = math.exp %73 : vector<8x256xf32>
    %cst_35 = arith.constant 1.000000e+00 : f32
    %75 = vector.broadcast %cst_35 : f32 to vector<8x256xf32>
    %76 = arith.addf %75, %74 : vector<8x256xf32>
    %77 = arith.divf %75, %76 : vector<8x256xf32>
    %78 = arith.truncf %77 : vector<8x256xf32> to vector<8x256xbf16>
    %c0_36 = arith.constant 0 : index
    %c0_37 = arith.constant 0 : index
    %79 = vector.load %arg12[%c0_36, %c0_37] : memref<8x512xbf16, #tpu.memory_space<vmem>>, vector<8x256xbf16>
    tpu.vector_store %arg12[%c0_36, %c0_37], %78 {strides = array<i32>} : memref<8x512xbf16, #tpu.memory_space<vmem>>, vector<8x256xbf16>,
    %80 = vector.extract_strided_slice %71 {offsets = [8, 0], sizes = [8, 256], strides = [1, 1]} : vector<16x256xf32> to vector<8x256xf32>
    %81 = arith.negf %80 : vector<8x256xf32>
    %82 = math.exp %81 : vector<8x256xf32>
    %cst_38 = arith.constant 1.000000e+00 : f32
    %83 = vector.broadcast %cst_38 : f32 to vector<8x256xf32>
    %84 = arith.addf %83, %82 : vector<8x256xf32>
    %85 = arith.divf %83, %84 : vector<8x256xf32>
    %86 = arith.truncf %85 : vector<8x256xf32> to vector<8x256xbf16>
    %c0_39 = arith.constant 0 : index
    %c256 = arith.constant 256 : index
    %87 = vector.load %arg12[%c0_39, %c256] : memref<8x512xbf16, #tpu.memory_space<vmem>>, vector<8x256xbf16>
    tpu.vector_store %arg12[%c0_39, %c256], %86 {strides = array<i32>} : memref<8x512xbf16, #tpu.memory_space<vmem>>, vector<8x256xbf16>,
    return
  }
  func.func @transform_0(%arg0: i32) -> (i32, i32) {
    %c0_i32 = arith.constant 0 : i32
    %c0_i32_0 = arith.constant 0 : i32
    return %arg0, %c0_i32 : i32, i32
  }
  func.func @transform_1(%arg0: i32) -> (i32, i32) {
    %c0_i32 = arith.constant 0 : i32
    %c0_i32_0 = arith.constant 0 : i32
    %c0_i32_1 = arith.constant 0 : i32
    return %c0_i32, %c0_i32_0 : i32, i32
  }
  func.func @transform_2(%arg0: i32) -> (i32, i32) {
    %c0_i32 = arith.constant 0 : i32
    %c0_i32_0 = arith.constant 0 : i32
    %c0_i32_1 = arith.constant 0 : i32
    return %c0_i32, %c0_i32_0 : i32, i32
  }
  func.func @transform_3(%arg0: i32) -> (i32, i32) {
    %c0_i32 = arith.constant 0 : i32
    %c0_i32_0 = arith.constant 0 : i32
    %c0_i32_1 = arith.constant 0 : i32
    return %c0_i32, %c0_i32_0 : i32, i32
  }
  func.func @transform_4(%arg0: i32) -> (i32, i32) {
    %c0_i32 = arith.constant 0 : i32
    %c0_i32_0 = arith.constant 0 : i32
    %c0_i32_1 = arith.constant 0 : i32
    return %c0_i32, %c0_i32_0 : i32, i32
  }
  func.func @transform_5(%arg0: i32) -> (i32, i32) {
    %c0_i32 = arith.constant 0 : i32
    %c0_i32_0 = arith.constant 0 : i32
    %c0_i32_1 = arith.constant 0 : i32
    return %c0_i32, %c0_i32_0 : i32, i32
  }
  func.func @transform_6(%arg0: i32) -> (i32, i32) {
    %c0_i32 = arith.constant 0 : i32
    %c0_i32_0 = arith.constant 0 : i32
    %c0_i32_1 = arith.constant 0 : i32
    return %c0_i32, %c0_i32_0 : i32, i32
  }
  func.func @transform_7(%arg0: i32) -> (i32, i32) {
    %c0_i32 = arith.constant 0 : i32
    %c0_i32_0 = arith.constant 0 : i32
    %c0_i32_1 = arith.constant 0 : i32
    return %c0_i32, %c0_i32_0 : i32, i32
  }
  func.func @transform_8(%arg0: i32) -> (i32, i32) {
    %c0_i32 = arith.constant 0 : i32
    %c0_i32_0 = arith.constant 0 : i32
    %c0_i32_1 = arith.constant 0 : i32
    return %c0_i32, %c0_i32_0 : i32, i32
  }
  func.func @transform_9(%arg0: i32) -> (i32, i32, i32) {
    %c0_i32 = arith.constant 0 : i32
    %c0_i32_0 = arith.constant 0 : i32
    %c0_i32_1 = arith.constant 0 : i32
    return %c0_i32, %arg0, %c0_i32_0 : i32, i32, i32
  }
  func.func @transform_10(%arg0: i32) -> (i32, i32) {
    %c0_i32 = arith.constant 0 : i32
    %c0_i32_0 = arith.constant 0 : i32
    return %arg0, %c0_i32 : i32, i32
  }
  func.func @transform_11(%arg0: i32) -> (i32, i32) {
    %c0_i32 = arith.constant 0 : i32
    %c0_i32_0 = arith.constant 0 : i32
    return %arg0, %c0_i32 : i32, i32
  }
}

</mosaic_0001>

<bundles_post_ra>
// kernel: tpu_custom_call.1
= control target key start
LH: loop header
LB: loop body
LE: loop exit
PB: predicated region body
PF: predicated region fallthrough
CT: control target
= control target key end

     0   :  { %17 = vsyncpa [#allocation4], 0  ;;  %s2664_s0 = inlined_call_operand.vmem [shape: f32[8,256], index: 0, kind: input, shape index: {}]   ;;  %s2665_s1 = inlined_call_operand.vmem [shape: bf16[256,512], index: 1, kind: input, shape index: {}]   ;;  %s2666_s2 = inlined_call_operand.vmem [shape: f32[1,512], index: 2, kind: input, shape index: {}]   ;;  %s2667_s3 = inlined_call_operand.vmem [shape: f32[512,4], index: 3, kind: input, shape index: {}]   ;;  %s2668_s4 = inlined_call_operand.hbm [shape: f32[1,4], index: 4, kind: input, shape index: {}]   ;;  %s2669_s5 = inlined_call_operand.vmem [shape: f32[2,512], index: 5, kind: input, shape index: {}]   ;;  %s2670_s6 = inlined_call_operand.vmem [shape: f32[1,512], index: 6, kind: input, shape index: {}]   ;;  %s2671_s7 = inlined_call_operand.hbm [shape: bf16[512,256], index: 7, kind: input, shape index: {}]   ;;  %s2672_s8 = inlined_call_operand.vmem [shape: f32[1,256], index: 8, kind: input, shape index: {}]   ;;  %s2673_s9 = inlined_call_operand.vmem [shape: f32[2,8,2], index: 9, kind: input, shape index: {}]   ;;  %s2674_s10 = inlined_call_operand.vmem [shape: f32[8,4], index: 10, kind: output, shape index: {0}]   ;;  %s2675_s11 = inlined_call_operand.hbm [shape: bf16[8,512], index: 11, kind: output, shape index: {1}]  }
   0x1   :  { %18 = vsyncpa [#allocation7], 0 }
   0x2   :  { %19 = vsyncpa [#allocation5], 0  ;;  %s2103_s17 = smov [#allocation3]   ;;  %s2104_s19 = smov [#allocation6]  }
   0x3   :  { %s34_s18 = sshll.u32 %s2103_s17, 4  ;;  %s47_s20 = sshll.u32 %s2104_s19, 4  ;;  %s35_s18 = int_to_ptr.vmem [resolvable:$true] %s34_s18  ;;  %s2173_s20 = int_to_ptr.vmem [resolvable:$true] %s47_s20 }
   0x4   :  { %s2031_s23 = scalar_lea.hbm %s2668_s4, 16 }
   0x5   :  { %p2032_p0 = scmp.ne.s32.totalorder %s2668_s4, %s2031_s23  ;;  %p2035_p1 = scmp.lt.u32.totalorder %s2031_s23, %s2668_s4 }
   0x7   :  { %p2037_p2 = pnand %p2035_p1, %p2032_p0 }
   0x9   :  { %2040 = shalt.err (!%p2037_p2)
}
   0xa   :  { %s2041_s28 = scalar_lea.vmem %s35_s18, 16  ;;  %s2045_s29 = scalar_lea.vmem %s35_s18, 32 }
   0xb   :  { %p2042_p3 = scmp.ne.s32.totalorder %s35_s18, %s2041_s28  ;;  %p2046_p4 = scmp.lt.s32.totalorder %s35_s18, %s35_s18 }
   0xc   :  { %p2047_p5 = scmp.lt.s32.totalorder %s2045_s29, %s2041_s28 }
   0xe   :  { %p2048_p6 = por %p2047_p5, %p2046_p4 }
  0x10   :  { %p2049_p7 = pnand %p2048_p6, %p2042_p3 }
  0x12   :  { %2052 = shalt.err (!%p2049_p7)
}
  0x13   :  { %37 = dma.hbm_to_vmem [thread:$0]  %s2668_s4, 16, %s35_s18, [#allocation4]  }
  0x14   :  { %s2053_s15 = scalar_lea.hbm %s2671_s7, 8192 }
  0x15   :  { %p2054_p8 = scmp.ne.s32.totalorder %s2671_s7, %s2053_s15  ;;  %p2057_p9 = scmp.lt.u32.totalorder %s2053_s15, %s2671_s7 }
  0x17   :  { %p2059_p10 = pnand %p2057_p9, %p2054_p8 }
  0x19   :  { %2062 = shalt.err (!%p2059_p10)
}
  0x1a   :  { %s2063_s22 = scalar_lea.vmem %s2173_s20, 8192  ;;  %p2068_p12 = scmp.lt.s32.totalorder %s2173_s20, %s2173_s20 }
  0x1b   :  { %p2064_p11 = scmp.ne.s32.totalorder %s2173_s20, %s2063_s22  ;;  %p2069_p13 = scmp.lt.s32.totalorder %s2063_s22, %s2063_s22 }
  0x1d   :  { %p2070_p0 = por %p2069_p13, %p2068_p12 }
  0x1f   :  { %p2071_p1 = pnand %p2070_p0, %p2064_p11 }
  0x21   :  { %2074 = shalt.err (!%p2071_p1)
}
  0x22   :  { %s2105_s4 = smov 128   ;;  %s2106_s18 = smov 8  }
  0x23   :  { %53 = dma.hbm_to_vmem [thread:$0]  %s2671_s7, 8192, %s2173_s20, [#allocation7], %s2105_s4, %s2105_s4, %s2106_s18  }
  0x24   :  { %2097 = dma.done.wait [#allocation4], 16  }
  0x25   :  { %2098 = vsyncadd [#allocation4], 4294967280 }
  0x26   :  { %2099 = dma.done.wait [#allocation7], 8192  }
  0x27   :  { %2100 = vsyncadd [#allocation7], 4294959104  ;;  %v1813_v0 = vld [vmem:[%s2665_s1 + $0x4] ss:$16 sps:$4 sm:$0xff]   ;;  %v1815_v1 = vld [vmem:[%s2665_s1] ss:$16 sps:$4 sm:$0xff]  }
  0x28   :  { %474 = vmatprep.subr.bf16.mxu1 %v1813_v0  ;;  %v1816_v2 = vld [vmem:[%s2665_s1 + $0x24] ss:$16 sps:$4 sm:$0xff]   ;;  %v1818_v3 = vld [vmem:[%s2665_s1 + $0x20] ss:$16 sps:$4 sm:$0xff]   ;;  %v65_v13 = vld [vmem:[%s2664_s0 + $0x8] sm:$0xff]  ;;  %s2107_s24 = smov 2  }
  0x29   :  { %475 = vmatpush1.bf16.msra.mxu1 %v1815_v1  ;;  %v1819_v4 = vld [vmem:[%s2665_s1 + $0x44] ss:$16 sps:$4 sm:$0xff]   ;;  %v1821_v5 = vld [vmem:[%s2665_s1 + $0x40] ss:$16 sps:$4 sm:$0xff]   ;;  %v2246_v14 = vpack.c.bf16 %v65_v13, %v65_v13  ;;  %v577_v28 = vld [vmem:[%s2667_s3 + $0x88] sm:$0xff]  ;;  %vm773_vm0 = vcmask 15360  }
  0x2a   :  { %476 = vmatprep.subr.bf16.mxu1 %v1816_v2  ;;  %v1822_v6 = vld [vmem:[%s2665_s1 + $0x64] ss:$16 sps:$4 sm:$0xff]   ;;  %v1824_v7 = vld [vmem:[%s2665_s1 + $0x60] ss:$16 sps:$4 sm:$0xff]   ;;  %v561_v31 = vld [vmem:[%s2667_s3 + $0x8] sm:$0xff]  ;;  %vm775_vm1 = vcmask 31744  }
  0x2b   :  { %v1825_v8 = vld [vmem:[%s2665_s1 + $0x84] ss:$16 sps:$4 sm:$0xff]   ;;  %v1827_v9 = vld [vmem:[%s2665_s1 + $0x80] ss:$16 sps:$4 sm:$0xff]   ;;  %506 = vmatprep.mubr.bf16.mxu1 %v2246_v14  ;;  %v579_v34 = vld [vmem:[%s2667_s3 + $0x98] sm:$0xff] }
  0x2c   :  { %v1828_v10 = vld [vmem:[%s2665_s1 + $0xa4] ss:$16 sps:$4 sm:$0xff]   ;;  %v1830_v11 = vld [vmem:[%s2665_s1 + $0xa0] ss:$16 sps:$4 sm:$0xff]   ;;  %v563_v36 = vld [vmem:[%s2667_s3 + $0x18] sm:$0xff] }
  0x2d   :  { %477 = vmatpush1.bf16.msra.mxu1 %v1818_v3  ;;  %v1831_v12 = vld [vmem:[%s2665_s1 + $0xc4] ss:$16 sps:$4 sm:$0xff]   ;;  %v1833_v15 = vld [vmem:[%s2665_s1 + $0xc0] ss:$16 sps:$4 sm:$0xff]   ;;  %v581_v39 = vld [vmem:[%s2667_s3 + $0xa8] sm:$0xff] }
  0x2e   :  { %478 = vmatprep.subr.bf16.mxu1 %v1819_v4  ;;  %v1834_v16 = vld [vmem:[%s2665_s1 + $0xe4] ss:$16 sps:$4 sm:$0xff]   ;;  %v1836_v17 = vld [vmem:[%s2665_s1 + $0xe0] ss:$16 sps:$4 sm:$0xff]   ;;  %v565_v45 = vld [vmem:[%s2667_s3 + $0x28] sm:$0xff] }
  0x2f   :  { %v1837_v18 = vld [vmem:[%s2665_s1 + $0x104] ss:$16 sps:$4 sm:$0xff]   ;;  %v1839_v19 = vld [vmem:[%s2665_s1 + $0x100] ss:$16 sps:$4 sm:$0xff]   ;;  %v583_v47 = vld [vmem:[%s2667_s3 + $0xb8] sm:$0xff] }
  0x30   :  { %v1840_v20 = vld [vmem:[%s2665_s1 + $0x124] ss:$16 sps:$4 sm:$0xff]   ;;  %v1842_v21 = vld [vmem:[%s2665_s1 + $0x120] ss:$16 sps:$4 sm:$0xff]   ;;  %v567_v51 = vld [vmem:[%s2667_s3 + $0x38] sm:$0xff] }
  0x31   :  { %479 = vmatpush1.bf16.msra.mxu1 %v1821_v5  ;;  %v1843_v22 = vld [vmem:[%s2665_s1 + $0x144] ss:$16 sps:$4 sm:$0xff]   ;;  %v1845_v23 = vld [vmem:[%s2665_s1 + $0x140] ss:$16 sps:$4 sm:$0xff]   ;;  %v1863_v59 = vld [vmem:[%s2665_s1 + $0xc] ss:$16 sps:$4 sm:$0xff]  }
  0x32   :  { %480 = vmatprep.subr.bf16.mxu1 %v1822_v6  ;;  %v1846_v24 = vld [vmem:[%s2665_s1 + $0x164] ss:$16 sps:$4 sm:$0xff]   ;;  %v1848_v25 = vld [vmem:[%s2665_s1 + $0x160] ss:$16 sps:$4 sm:$0xff]   ;;  %v1861_v60 = vld [vmem:[%s2665_s1 + $0x8] ss:$16 sps:$4 sm:$0xff]  }
  0x33   :  { %v1849_v26 = vld [vmem:[%s2665_s1 + $0x184] ss:$16 sps:$4 sm:$0xff]   ;;  %v1851_v40 = vld [vmem:[%s2665_s1 + $0x180] ss:$16 sps:$4 sm:$0xff]   ;;  %v1866_v62 = vld [vmem:[%s2665_s1 + $0x2c] ss:$16 sps:$4 sm:$0xff]  }
  0x34   :  { %v576_v27 = vld [vmem:[%s2667_s3 + $0x80] sm:$0xff]  ;;  %v578_v32 = vld [vmem:[%s2667_s3 + $0x90] sm:$0xff]  ;;  %v1864_v63 = vld [vmem:[%s2665_s1 + $0x28] ss:$16 sps:$4 sm:$0xff]  }
  0x35   :  { %481 = vmatpush1.bf16.msra.mxu1 %v1824_v7  ;;  %v1725_v29 = vpack.c.bf16 %v577_v28, %v576_v27  ;;  %v560_v30 = vld [vmem:[%s2667_s3] sm:$0xff]  ;;  %v562_v35 = vld [vmem:[%s2667_s3 + $0x10] sm:$0xff]  ;;  %v1729_v37 = vpack.c.bf16 %v579_v34, %v578_v32  ;;  %v1869_v0 = vld [vmem:[%s2665_s1 + $0x4c] ss:$16 sps:$4 sm:$0xff]  }
  0x36   :  { %482 = vmatprep.subr.bf16.mxu1 %v1825_v8  ;;  %v1727_v33 = vpack.c.bf16 %v561_v31, %v560_v30  ;;  %v580_v38 = vld [vmem:[%s2667_s3 + $0xa0] sm:$0xff]  ;;  %v1731_v42 = vpack.c.bf16 %v563_v36, %v562_v35  ;;  %v582_v46 = vld [vmem:[%s2667_s3 + $0xb0] sm:$0xff]  ;;  %v1867_v1 = vld [vmem:[%s2665_s1 + $0x48] ss:$16 sps:$4 sm:$0xff]  }
  0x37   :  { %1726 = vmatprep.subr.bf16.mxu0 %v1725_v29  ;;  %v1852_v41 = vld [vmem:[%s2665_s1 + $0x1a4] ss:$16 sps:$4 sm:$0xff]   ;;  %v1733_v44 = vpack.c.bf16 %v581_v39, %v580_v38  ;;  %v1854_v48 = vld [vmem:[%s2665_s1 + $0x1a0] ss:$16 sps:$4 sm:$0xff]   ;;  %v1737_v53 = vpack.c.bf16 %v583_v47, %v582_v46  ;;  %v1872_v2 = vld [vmem:[%s2665_s1 + $0x6c] ss:$16 sps:$4 sm:$0xff]  }
  0x38   :  { %1728 = vmatpush3.bf16.msra.mxu0 %v1727_v33  ;;  %v564_v43 = vld [vmem:[%s2667_s3 + $0x20] sm:$0xff]  ;;  %v566_v50 = vld [vmem:[%s2667_s3 + $0x30] sm:$0xff]  ;;  %v1870_v3 = vld [vmem:[%s2665_s1 + $0x68] ss:$16 sps:$4 sm:$0xff]  }
  0x39   :  { %483 = vmatpush1.bf16.msra.mxu1 %v1827_v9  ;;  %1730 = vmatprep.subr.bf16.mxu0 %v1729_v37  ;;  %v1855_v49 = vld [vmem:[%s2665_s1 + $0x1c4] ss:$16 sps:$4 sm:$0xff]   ;;  %v1735_v52 = vpack.c.bf16 %v565_v45, %v564_v43  ;;  %v1857_v54 = vld [vmem:[%s2665_s1 + $0x1c0] ss:$16 sps:$4 sm:$0xff]   ;;  %v1739_v56 = vpack.c.bf16 %v567_v51, %v566_v50  ;;  %v1875_v4 = vld [vmem:[%s2665_s1 + $0x8c] ss:$16 sps:$4 sm:$0xff]  }
  0x3a   :  { %484 = vmatprep.subr.bf16.mxu1 %v1828_v10  ;;  %v1858_v55 = vld [vmem:[%s2665_s1 + $0x1e4] ss:$16 sps:$4 sm:$0xff]   ;;  %v1860_v57 = vld [vmem:[%s2665_s1 + $0x1e0] ss:$16 sps:$4 sm:$0xff]   ;;  %v1873_v5 = vld [vmem:[%s2665_s1 + $0x88] ss:$16 sps:$4 sm:$0xff]  }
  0x3b   :  { %v64_v58 = vld [vmem:[%s2664_s0] sm:$0xff]  ;;  %v1878_v6 = vld [vmem:[%s2665_s1 + $0xac] ss:$16 sps:$4 sm:$0xff]   ;;  %v1876_v7 = vld [vmem:[%s2665_s1 + $0xa8] ss:$16 sps:$4 sm:$0xff]  }
  0x3c   :  { %1732 = vmatpush3.bf16.msra.mxu0 %v1731_v42  ;;  %v2363_v61 = vpack.c.bf16 %v64_v58, %v64_v58  ;;  %v1881_v8 = vld [vmem:[%s2665_s1 + $0xcc] ss:$16 sps:$4 sm:$0xff]   ;;  %v1879_v9 = vld [vmem:[%s2665_s1 + $0xc8] ss:$16 sps:$4 sm:$0xff]   ;;  %v584_v28 = vld [vmem:[%s2667_s3 + $0xc0] sm:$0xff] }
  0x3d   :  { %485 = vmatpush1.bf16.msra.mxu1 %v1830_v11  ;;  %1734 = vmatprep.subr.bf16.mxu0 %v1733_v44  ;;  %v1884_v10 = vld [vmem:[%s2665_s1 + $0xec] ss:$16 sps:$4 sm:$0xff]   ;;  %v1882_v11 = vld [vmem:[%s2665_s1 + $0xe8] ss:$16 sps:$4 sm:$0xff]   ;;  %v568_v31 = vld [vmem:[%s2667_s3 + $0x40] sm:$0xff] }
  0x3e   :  { %486 = vmatprep.subr.bf16.mxu1 %v1831_v12  ;;  %v1887_v12 = vld [vmem:[%s2665_s1 + $0x10c] ss:$16 sps:$4 sm:$0xff]   ;;  %v1885_v13 = vld [vmem:[%s2665_s1 + $0x108] ss:$16 sps:$4 sm:$0xff]   ;;  %v586_v34 = vld [vmem:[%s2667_s3 + $0xd0] sm:$0xff] }
  0x3f   :  { %v1906_v27 = vld [vmem:[%s2665_s1 + $0x1e8] ss:$16 sps:$4 sm:$0xff]   ;;  %v570_v37 = vld [vmem:[%s2667_s3 + $0x50] sm:$0xff]  ;;  %v572_v42 = vld [vmem:[%s2667_s3 + $0x60] sm:$0xff] }
  0x40   :  { %1736 = vmatpush3.bf16.msra.mxu0 %v1735_v52  ;;  %v585_v29 = vld [vmem:[%s2667_s3 + $0xc8] sm:$0xff]  ;;  %v587_v35 = vld [vmem:[%s2667_s3 + $0xd8] sm:$0xff]  ;;  %v590_v45 = vld [vmem:[%s2667_s3 + $0xf0] sm:$0xff] }
  0x41   :  { %487 = vmatpush1.bf16.msra.mxu1 %v1833_v15  ;;  %1738 = vmatprep.subr.bf16.mxu0 %v1737_v53  ;;  %v1888_v15 = vld [vmem:[%s2665_s1 + $0x128] ss:$16 sps:$4 sm:$0xff]   ;;  %v1741_v30 = vpack.c.bf16 %v585_v29, %v584_v28  ;;  %v1745_v36 = vpack.c.bf16 %v587_v35, %v586_v34  ;;  %v608_v52 = vld [vmem:[%s2667_s3 + $0x180] sm:$0xff]  ;;  %v622_v29 = vld [vmem:[%s2667_s3 + $0x1f0] sm:$0xff] }
  0x42   :  { %488 = vmatprep.subr.bf16.mxu1 %v1834_v16  ;;  %v1893_v16 = vld [vmem:[%s2665_s1 + $0x14c] ss:$16 sps:$4 sm:$0xff]  }
  0x43   :  { %v569_v32 = vld [vmem:[%s2667_s3 + $0x48] sm:$0xff]  ;;  %v571_v38 = vld [vmem:[%s2667_s3 + $0x58] sm:$0xff] }
  0x44   :  { %1740 = vmatpush3.bf16.msra.mxu0 %v1739_v56  ;;  %v1743_v33 = vpack.c.bf16 %v569_v32, %v568_v31  ;;  %v1747_v39 = vpack.c.bf16 %v571_v38, %v570_v37  ;;  %v573_v44 = vld [vmem:[%s2667_s3 + $0x68] sm:$0xff]  ;;  %v591_v46 = vld [vmem:[%s2667_s3 + $0xf8] sm:$0xff]  ;;  %v869_v37 = vld [vmem:[%s2673_s9] sm:$0xff]  ;;  %v134_v38 = vlaneseq }
  0x45   :  { %489 = vmatpush1.bf16.msra.mxu1 %v1836_v17  ;;  %v1891_v17 = vld [vmem:[%s2665_s1 + $0x148] ss:$16 sps:$4 sm:$0xff]   ;;  %1742 = vmatprep.subr.bf16.mxu0 %v1741_v30  ;;  %v1751_v47 = vpack.c.bf16 %v573_v44, %v572_v42 }
  0x46   :  { %490 = vmatprep.subr.bf16.mxu1 %v1837_v18  ;;  %v1896_v18 = vld [vmem:[%s2665_s1 + $0x16c] ss:$16 sps:$4 sm:$0xff]  }
  0x47   :  { %v575_v50 = vld [vmem:[%s2667_s3 + $0x78] sm:$0xff]  ;;  %v609_v53 = vld [vmem:[%s2667_s3 + $0x188] sm:$0xff] }
  0x48   :  { %1744 = vmatpush3.bf16.msra.mxu0 %v1743_v33  ;;  %v593_v56 = vld [vmem:[%s2667_s3 + $0x108] sm:$0xff]  ;;  %v611_v58 = vld [vmem:[%s2667_s3 + $0x198] sm:$0xff]  ;;  %v606_v33 = vld [vmem:[%s2667_s3 + $0x170] sm:$0xff] }
  0x49   :  { %491 = vmatpush1.bf16.msra.mxu1 %v1839_v19  ;;  %v1894_v19 = vld [vmem:[%s2665_s1 + $0x168] ss:$16 sps:$4 sm:$0xff]   ;;  %1746 = vmatprep.subr.bf16.mxu0 %v1745_v36 }
  0x4a   :  { %492 = vmatprep.subr.bf16.mxu1 %v1840_v20  ;;  %v1899_v20 = vld [vmem:[%s2665_s1 + $0x18c] ss:$16 sps:$4 sm:$0xff]  }
  0x4b   :  { %v605_v28 = vld [vmem:[%s2667_s3 + $0x168] sm:$0xff]  ;;  %v623_v30 = vld [vmem:[%s2667_s3 + $0x1f8] sm:$0xff] }
  0x4c   :  { %1748 = vmatpush3.bf16.msra.mxu0 %v1747_v39  ;;  %v1785_v32 = vpack.c.bf16 %v623_v30, %v622_v29  ;;  %v607_v34 = vld [vmem:[%s2667_s3 + $0x178] sm:$0xff]  ;;  %v1582_v36 = vld [vmem:[%s2673_s9 + $0x8] sm:$0xff]  ;;  %v135_v39 = vshrl.u32 %v134_v38, 7  ;;  %v2110_v29 = vmov 1  }
  0x4d   :  { %493 = vmatpush1.bf16.msra.mxu1 %v1842_v21  ;;  %v1897_v21 = vld [vmem:[%s2665_s1 + $0x188] ss:$16 sps:$4 sm:$0xff]   ;;  %v1787_v35 = vpack.c.bf16 %v607_v34, %v606_v33  ;;  %915 = vrot.lane.b32.xlu0 %v1582_v36, %s2107_s24 }
  0x4e   :  { %494 = vmatprep.subr.bf16.mxu1 %v1843_v22  ;;  %v1902_v22 = vld [vmem:[%s2665_s1 + $0x1ac] ss:$16 sps:$4 sm:$0xff]   ;;  %v2613_v42 = vsub.s32 1, %v135_v39 }
  0x4f   :  { %v1936_v33 = vld [vmem:[#allocation6 + $0x90] ss:$8 sps:$4 sm:$0xff]   ;;  %v1938_v34 = vld [vmem:[#allocation6 + $0x94] ss:$8 sps:$4 sm:$0xff]   ;;  %v1939_v38 = vld [vmem:[#allocation6 + $0xa0] ss:$8 sps:$4 sm:$0xff]  }
  0x51   :  { %495 = vmatpush1.bf16.msra.mxu1 %v1845_v23  ;;  %v1900_v23 = vld [vmem:[%s2665_s1 + $0x1a8] ss:$16 sps:$4 sm:$0xff]   ;;  %871 = vrot.lane.b32.xlu0 %v869_v37, %s2107_s24 }
  0x52   :  { %496 = vmatprep.subr.bf16.mxu1 %v1846_v24  ;;  %v1905_v24 = vld [vmem:[%s2665_s1 + $0x1cc] ss:$16 sps:$4 sm:$0xff]  }
  0x55   :  { %497 = vmatpush1.bf16.msra.mxu1 %v1848_v25  ;;  %v1903_v25 = vld [vmem:[%s2665_s1 + $0x1c8] ss:$16 sps:$4 sm:$0xff]  }
  0x56   :  { %498 = vmatprep.subr.bf16.mxu1 %v1849_v26  ;;  %v1908_v26 = vld [vmem:[%s2665_s1 + $0x1ec] ss:$16 sps:$4 sm:$0xff]  }
  0x59   :  { %499 = vmatpush1.bf16.msra.mxu1 %v1851_v40  ;;  %v588_v40 = vld [vmem:[%s2667_s3 + $0xe0] sm:$0xff] }
  0x5a   :  { %500 = vmatprep.subr.bf16.mxu1 %v1852_v41  ;;  %v589_v41 = vld [vmem:[%s2667_s3 + $0xe8] sm:$0xff] }
  0x5b   :  { %v1749_v43 = vpack.c.bf16 %v589_v41, %v588_v40  ;;  %v2608_v40 = vsub.s32 0, %v135_v39  ;;  %v132_v41 = vld [vmem:[%s2666_s2] sm:$0xf] }
  0x5c   :  { %v141_v44 = vrot.slane %v132_v41, %v2613_v42 }
  0x5d   :  { %501 = vmatpush1.bf16.msra.mxu1 %v1854_v48  ;;  %v1753_v48 = vpack.c.bf16 %v591_v46, %v590_v45  ;;  %1750 = vmatprep.subr.bf16.mxu0 %v1749_v43  ;;  %v137_v43 = vrot.slane %v132_v41, %v2608_v40 }
  0x5e   :  { %502 = vmatprep.subr.bf16.mxu1 %v1855_v49  ;;  %v574_v49 = vld [vmem:[%s2667_s3 + $0x70] sm:$0xff]  ;;  %1752 = vmatpush3.bf16.msra.mxu0 %v1751_v47 }
  0x5f   :  { %v1755_v51 = vpack.c.bf16 %v575_v50, %v574_v49  ;;  %1754 = vmatprep.subr.bf16.mxu0 %v1753_v48 }
  0x61   :  { %503 = vmatpush1.bf16.msra.mxu1 %v1857_v54  ;;  %v592_v54 = vld [vmem:[%s2667_s3 + $0x100] sm:$0xff] }
  0x62   :  { %504 = vmatprep.subr.bf16.mxu1 %v1858_v55  ;;  %1756 = vmatpush3.bf16.msra.mxu0 %v1755_v51  ;;  %v1757_v55 = vpack.c.bf16 %v609_v53, %v608_v52  ;;  %v2617_v53 = vsub.s32 2, %v135_v39 }
  0x65   :  { %505 = vmatpush1.bf16.msra.mxu1 %v1860_v57  ;;  %v610_v57 = vld [vmem:[%s2667_s3 + $0x190] sm:$0xff] }
  0x66   :  { %515 = vmatprep.subr.bf16.mxu1 %v1863_v59  ;;  %v1759_v59 = vpack.c.bf16 %v593_v56, %v592_v54  ;;  %v2619_v54 = vsub.s32 3, %v135_v39 }
  0x68   :  { %507 = vmatmul.mubr.bf16.vlgmr.msra.gmra.mrb[0].mxu1 %v2363_v61  ;;  %v149_v56 = vrot.slane %v132_v41, %v2619_v54 }
  0x69   :  { %516 = vmatpush1.bf16.msra.mxu1 %v1861_v60  ;;  %547 = vmatprep.mubr.bf16.mxu1 %v2246_v14  ;;  %v1890_v14 = vld [vmem:[%s2665_s1 + $0x12c] ss:$16 sps:$4 sm:$0xff]   ;;  %v1761_v60 = vpack.c.bf16 %v611_v58, %v610_v57 }
  0x6a   :  { %517 = vmatprep.subr.bf16.mxu1 %v1866_v62  ;;  %v595_v62 = vld [vmem:[%s2667_s3 + $0x118] sm:$0xff] }
  0x6d   :  { %518 = vmatpush1.bf16.msra.mxu1 %v1864_v63  ;;  %v612_v63 = vld [vmem:[%s2667_s3 + $0x1a0] sm:$0xff] }
  0x6e   :  { %519 = vmatprep.subr.bf16.mxu1 %v1869_v0  ;;  %v613_v0 = vld [vmem:[%s2667_s3 + $0x1a8] sm:$0xff] }
  0x71   :  { %520 = vmatpush1.bf16.msra.mxu1 %v1867_v1 }
  0x72   :  { %521 = vmatprep.subr.bf16.mxu1 %v1872_v2  ;;  %v1765_v2 = vpack.c.bf16 %v613_v0, %v612_v63 }
  0x75   :  { %522 = vmatpush1.bf16.msra.mxu1 %v1870_v3  ;;  %v596_v3 = vld [vmem:[%s2667_s3 + $0x120] sm:$0xff] }
  0x76   :  { %523 = vmatprep.subr.bf16.mxu1 %v1875_v4  ;;  %v597_v4 = vld [vmem:[%s2667_s3 + $0x128] sm:$0xff] }
  0x79   :  { %524 = vmatpush1.bf16.msra.mxu1 %v1873_v5  ;;  %v614_v5 = vld [vmem:[%s2667_s3 + $0x1b0] sm:$0xff] }
  0x7a   :  { %525 = vmatprep.subr.bf16.mxu1 %v1878_v6  ;;  %v615_v6 = vld [vmem:[%s2667_s3 + $0x1b8] sm:$0xff] }
  0x7d   :  { %526 = vmatpush1.bf16.msra.mxu1 %v1876_v7  ;;  %v1767_v7 = vpack.c.bf16 %v597_v4, %v596_v3  ;;  %v1909_v3 = vld [vmem:[#allocation6] ss:$8 sps:$4 sm:$0xff]   ;;  %v1911_v4 = vld [vmem:[#allocation6 + $0x4] ss:$8 sps:$4 sm:$0xff]  }
  0x7e   :  { %527 = vmatprep.subr.bf16.mxu1 %v1881_v8  ;;  %v1769_v8 = vpack.c.bf16 %v615_v6, %v614_v5  ;;  %v1914_v5 = vld [vmem:[#allocation6 + $0x14] ss:$8 sps:$4 sm:$0xff]   ;;  %1368 = vmatprep.subr.bf16.mxu0 %v1911_v4  ;;  %v1912_v6 = vld [vmem:[#allocation6 + $0x10] ss:$8 sps:$4 sm:$0xff]  }
  0x81   :  { %528 = vmatpush1.bf16.msra.mxu1 %v1879_v9  ;;  %v598_v9 = vld [vmem:[%s2667_s3 + $0x130] sm:$0xff] }
  0x82   :  { %529 = vmatprep.subr.bf16.mxu1 %v1884_v10  ;;  %v599_v10 = vld [vmem:[%s2667_s3 + $0x138] sm:$0xff] }
  0x85   :  { %530 = vmatpush1.bf16.msra.mxu1 %v1882_v11  ;;  %v1771_v11 = vpack.c.bf16 %v599_v10, %v598_v9  ;;  %v1920_v9 = vld [vmem:[#allocation6 + $0x34] ss:$8 sps:$4 sm:$0xff]   ;;  %v1918_v10 = vld [vmem:[#allocation6 + $0x30] ss:$8 sps:$4 sm:$0xff]  }
  0x86   :  { %531 = vmatprep.subr.bf16.mxu1 %v1887_v12  ;;  %v616_v12 = vld [vmem:[%s2667_s3 + $0x1c0] sm:$0xff] }
  0x89   :  { %532 = vmatpush1.bf16.msra.mxu1 %v1885_v13  ;;  %v617_v13 = vld [vmem:[%s2667_s3 + $0x1c8] sm:$0xff] }
  0x8a   :  { %533 = vmatprep.subr.bf16.mxu1 %v1890_v14  ;;  %v1773_v14 = vpack.c.bf16 %v617_v13, %v616_v12  ;;  %v1921_v12 = vld [vmem:[#allocation6 + $0x40] ss:$8 sps:$4 sm:$0xff]   ;;  %v1926_v13 = vld [vmem:[#allocation6 + $0x54] ss:$8 sps:$4 sm:$0xff]  }
  0x8d   :  { %534 = vmatpush1.bf16.msra.mxu1 %v1888_v15  ;;  %v600_v15 = vld [vmem:[%s2667_s3 + $0x140] sm:$0xff] }
  0x8e   :  { %535 = vmatprep.subr.bf16.mxu1 %v1893_v16  ;;  %v601_v16 = vld [vmem:[%s2667_s3 + $0x148] sm:$0xff] }
  0x91   :  { %536 = vmatpush1.bf16.msra.mxu1 %v1891_v17  ;;  %v1775_v17 = vpack.c.bf16 %v601_v16, %v600_v15  ;;  %v1929_v15 = vld [vmem:[#allocation6 + $0x64] ss:$8 sps:$4 sm:$0xff]   ;;  %v1927_v16 = vld [vmem:[#allocation6 + $0x60] ss:$8 sps:$4 sm:$0xff]  }
  0x92   :  { %537 = vmatprep.subr.bf16.mxu1 %v1896_v18  ;;  %v618_v18 = vld [vmem:[%s2667_s3 + $0x1d0] sm:$0xff] }
  0x95   :  { %538 = vmatpush1.bf16.msra.mxu1 %v1894_v19  ;;  %v619_v19 = vld [vmem:[%s2667_s3 + $0x1d8] sm:$0xff] }
  0x96   :  { %539 = vmatprep.subr.bf16.mxu1 %v1899_v20  ;;  %v1777_v20 = vpack.c.bf16 %v619_v19, %v618_v18 }
  0x99   :  { %540 = vmatpush1.bf16.msra.mxu1 %v1897_v21  ;;  %v602_v21 = vld [vmem:[%s2667_s3 + $0x150] sm:$0xff] }
  0x9a   :  { %541 = vmatprep.subr.bf16.mxu1 %v1902_v22  ;;  %v603_v22 = vld [vmem:[%s2667_s3 + $0x158] sm:$0xff] }
  0x9d   :  { %542 = vmatpush1.bf16.msra.mxu1 %v1900_v23  ;;  %v1779_v23 = vpack.c.bf16 %v603_v22, %v602_v21 }
  0x9e   :  { %543 = vmatprep.subr.bf16.mxu1 %v1905_v24  ;;  %v620_v24 = vld [vmem:[%s2667_s3 + $0x1e0] sm:$0xff] }
  0xa1   :  { %544 = vmatpush1.bf16.msra.mxu1 %v1903_v25  ;;  %v621_v25 = vld [vmem:[%s2667_s3 + $0x1e8] sm:$0xff] }
  0xa2   :  { %545 = vmatprep.subr.bf16.mxu1 %v1908_v26  ;;  %v604_v26 = vld [vmem:[%s2667_s3 + $0x160] sm:$0xff] }
  0xa3   :  { %v1783_v31 = vpack.c.bf16 %v605_v28, %v604_v26  ;;  %v1930_v28 = vld [vmem:[#allocation6 + $0x70] ss:$8 sps:$4 sm:$0xff]  }
  0xa5   :  { %546 = vmatpush1.bf16.msra.mxu1 %v1906_v27  ;;  %v1781_v27 = vpack.c.bf16 %v621_v25, %v620_v24 }
  0xa6   :  { %1758 = vmatprep.subr.bf16.mxu1 %v1757_v55  ;;  %v145_v55 = vrot.slane %v132_v41, %v2617_v53 }
  0xa8   :  { %548 = vmatmul.mubr.bf16.vlgmr.msra.gmra.mrb[4].mxu1 %v2363_v61  ;;  %v594_v61 = vld [vmem:[%s2667_s3 + $0x110] sm:$0xff] }
  0xa9   :  { %1760 = vmatpush3.bf16.msra.mxu1 %v1759_v59  ;;  %v1763_v1 = vpack.c.bf16 %v595_v62, %v594_v61 }
  0xaa   :  { %1762 = vmatprep.subr.bf16.mxu1 %v1761_v60 }
  0xad   :  { %1764 = vmatpush3.bf16.msra.mxu1 %v1763_v1  ;;  %v2108_v1 = vmov 0  }
  0xae   :  { %1766 = vmatprep.subr.bf16.mxu1 %v1765_v2  ;;  %1807 = vset.pattern.permute.xlu1 %v2108_v1  ;;  %v2109_v2 = vmov 2  }
  0xaf   :  { %1809 = vset.pattern.permute.xlu0 %v2109_v2 }
  0xb1   :  { %1768 = vmatpush3.bf16.msra.mxu1 %v1767_v7  ;;  %v1917_v7 = vld [vmem:[#allocation6 + $0x24] ss:$8 sps:$4 sm:$0xff]  }
  0xb2   :  { %1770 = vmatprep.subr.bf16.mxu1 %v1769_v8  ;;  %v1915_v8 = vld [vmem:[#allocation6 + $0x20] ss:$8 sps:$4 sm:$0xff]  }
  0xb5   :  { %1772 = vmatpush3.bf16.msra.mxu1 %v1771_v11  ;;  %v1923_v11 = vld [vmem:[#allocation6 + $0x44] ss:$8 sps:$4 sm:$0xff]  }
  0xb6   :  { %1774 = vmatprep.subr.bf16.mxu1 %v1773_v14  ;;  %v1924_v14 = vld [vmem:[#allocation6 + $0x50] ss:$8 sps:$4 sm:$0xff]  }
  0xb9   :  { %1776 = vmatpush3.bf16.msra.mxu1 %v1775_v17 }
  0xba   :  { %1778 = vmatprep.subr.bf16.mxu1 %v1777_v20  ;;  %v1580_v20 = vld [vmem:[#allocation3] ss:$0 sm:$0xff] }
  0xbd   :  { %1780 = vmatpush3.bf16.msra.mxu1 %v1779_v23 }
  0xbe   :  { %1782 = vmatprep.subr.bf16.mxu1 %v1781_v27  ;;  %v1932_v27 = vld [vmem:[#allocation6 + $0x74] ss:$8 sps:$4 sm:$0xff]  }
  0xbf   :  { %v916_v30 = vpop.permute.xlu0 %915 }
  0xc1   :  { %1784 = vmatpush3.bf16.msra.mxu1 %v1783_v31  ;;  %v1935_v31 = vld [vmem:[#allocation6 + $0x84] ss:$8 sps:$4 sm:$0xff]  }
  0xc2   :  { %1786 = vmatprep.subr.bf16.mxu1 %v1785_v32  ;;  %v1933_v32 = vld [vmem:[#allocation6 + $0x80] ss:$8 sps:$4 sm:$0xff]  }
  0xc3   :  { %v872_v36 = vpop.permute.xlu0 %871 }
  0xc5   :  { %1788 = vmatpush3.bf16.msra.mxu1 %v1787_v35  ;;  %v1941_v35 = vld [vmem:[#allocation6 + $0xa4] ss:$8 sps:$4 sm:$0xff]  }
 0x13b   :  { %v508_v45 = vpop.f32.mrb[0].mxu1 }
 0x13c   :  { %v509_v46 = vadd.f32 %v508_v45, %v137_v43  ;;  %v510_v47 = vpop.f32.mrb[1].mxu1  ;;  %v1942_v45 = vld [vmem:[#allocation6 + $0xb0] ss:$8 sps:$4 sm:$0xff]  }
 0x13d   :  { %v511_v48 = vadd.f32 %v510_v47, %v141_v44  ;;  %v512_v49 = vpop.f32.mrb[2].mxu1  ;;  %v1944_v44 = vld [vmem:[#allocation6 + $0xb4] ss:$8 sps:$4 sm:$0xff]   ;;  %v1947_v47 = vld [vmem:[#allocation6 + $0xc4] ss:$8 sps:$4 sm:$0xff]  }
 0x13e   :  { %2005 = vtanh.f32 %v509_v46  ;;  %v513_v50 = vpop.f32.mrb[3].mxu1  ;;  %v2111_v46 = vmov 3   ;;  %v1950_v49 = vld [vmem:[#allocation6 + $0xd4] ss:$8 sps:$4 sm:$0xff]  }
 0x13f   :  { %2007 = vtanh.f32 %v511_v48  ;;  %v1945_v48 = vld [vmem:[#allocation6 + $0xc0] ss:$8 sps:$4 sm:$0xff]   ;;  %v1948_v50 = vld [vmem:[#allocation6 + $0xd0] ss:$8 sps:$4 sm:$0xff]  }
 0x148   :  { %v2006_v51 = vpop.eup %2005 }
 0x149   :  { %v2008_v52 = vpop.eup %2007 }
 0x14a   :  { %695 = vmatprep.mubr.f32.mxu0 %v2008_v52  ;;  %v1951_v52 = vld [vmem:[#allocation6 + $0xe0] ss:$8 sps:$4 sm:$0xff]  }
 0x14b   :  { %696 = vmatmul.mubr.f32.vlgmr.msra.gmra.mrb[0].mxu0 %v2006_v51  ;;  %v1953_v51 = vld [vmem:[#allocation6 + $0xe4] ss:$8 sps:$4 sm:$0xff]  }
 0x14c   :  { %1369 = vmatpush1.bf16.msra.mxu0 %v1909_v3 }
 0x14d   :  { %1370 = vmatprep.subr.bf16.mxu0 %v1914_v5 }
 0x150   :  { %1371 = vmatpush1.bf16.msra.mxu0 %v1912_v6 }
 0x151   :  { %1372 = vmatprep.subr.bf16.mxu0 %v1917_v7 }
 0x154   :  { %1373 = vmatpush1.bf16.msra.mxu0 %v1915_v8 }
 0x155   :  { %1374 = vmatprep.subr.bf16.mxu0 %v1920_v9 }
 0x158   :  { %1375 = vmatpush1.bf16.msra.mxu0 %v1918_v10 }
 0x159   :  { %1376 = vmatprep.subr.bf16.mxu0 %v1923_v11 }
 0x15c   :  { %1377 = vmatpush1.bf16.msra.mxu0 %v1921_v12 }
 0x15d   :  { %1378 = vmatprep.subr.bf16.mxu0 %v1926_v13 }
 0x160   :  { %1379 = vmatpush1.bf16.msra.mxu0 %v1924_v14 }
 0x161   :  { %1380 = vmatprep.subr.bf16.mxu0 %v1929_v15 }
 0x164   :  { %1381 = vmatpush1.bf16.msra.mxu0 %v1927_v16 }
 0x165   :  { %1382 = vmatprep.subr.bf16.mxu0 %v1932_v27 }
 0x168   :  { %1383 = vmatpush1.bf16.msra.mxu0 %v1930_v28 }
 0x169   :  { %1384 = vmatprep.subr.bf16.mxu0 %v1935_v31 }
 0x16c   :  { %1385 = vmatpush1.bf16.msra.mxu0 %v1933_v32 }
 0x16d   :  { %1386 = vmatprep.subr.bf16.mxu0 %v1938_v34 }
 0x170   :  { %1387 = vmatpush1.bf16.msra.mxu0 %v1936_v33 }
 0x171   :  { %1388 = vmatprep.subr.bf16.mxu0 %v1941_v35 }
 0x174   :  { %1389 = vmatpush1.bf16.msra.mxu0 %v1939_v38 }
 0x175   :  { %1390 = vmatprep.subr.bf16.mxu0 %v1944_v44 }
 0x178   :  { %1391 = vmatpush1.bf16.msra.mxu0 %v1942_v45 }
 0x179   :  { %1392 = vmatprep.subr.bf16.mxu0 %v1947_v47 }
 0x17b   :  { %v549_v57 = vpop.f32.mrb[4].mxu1 }
 0x17c   :  { %v550_v58 = vadd.f32 %v549_v57, %v145_v55  ;;  %v551_v59 = vpop.f32.mrb[5].mxu1  ;;  %1393 = vmatpush1.bf16.msra.mxu0 %v1945_v48  ;;  %v1956_v55 = vld [vmem:[#allocation6 + $0xf4] ss:$8 sps:$4 sm:$0xff]   ;;  %v1959_v57 = vld [vmem:[#allocation6 + $0x104] ss:$8 sps:$4 sm:$0xff]  }
 0x17d   :  { %v552_v60 = vadd.f32 %v551_v59, %v149_v56  ;;  %v553_v61 = vpop.f32.mrb[6].mxu1  ;;  %1394 = vmatprep.subr.bf16.mxu0 %v1950_v49  ;;  %v1954_v56 = vld [vmem:[#allocation6 + $0xf0] ss:$8 sps:$4 sm:$0xff]  }
 0x17e   :  { %v554_v62 = vpop.f32.mrb[7].mxu1  ;;  %v780_v61 = vld [vmem:[%s2670_s6] sm:$0xf] }
 0x17f   :  { %2009 = vtanh.f32 %v552_v60  ;;  %v1581_v60 = vld [vmem:[%s2669_s5 + $0x1] ss:$2 sm:$0xf]  ;;  %v815_v6 = vrot.slane %v780_v61, %v2608_v40  ;;  %v819_v7 = vrot.slane %v780_v61, %v2613_v42  ;;  %v823_v8 = vrot.slane %v780_v61, %v2617_v53 }
 0x180   :  { %2011 = vtanh.f32 %v550_v58  ;;  %1395 = vmatpush1.bf16.msra.mxu0 %v1948_v50  ;;  %v777_v58 = vld [vmem:[%s2669_s5] ss:$2 sm:$0xf]  ;;  %v848_v3 = vrot.slane %v1581_v60, %v2613_v42  ;;  %v852_v4 = vrot.slane %v1581_v60, %v2617_v53  ;;  %v856_v5 = vrot.slane %v1581_v60, %v2619_v54 }
 0x181   :  { %1396 = vmatprep.subr.bf16.mxu0 %v1953_v51  ;;  %v790_v62 = vrot.slane %v777_v58, %v2608_v40  ;;  %v802_v1 = vrot.slane %v777_v58, %v2619_v54  ;;  %v827_v9 = vrot.slane %v780_v61, %v2619_v54 }
 0x184   :  { %1397 = vmatpush1.bf16.msra.mxu0 %v1951_v52 }
 0x185   :  { %1398 = vmatprep.subr.bf16.mxu0 %v1956_v55 }
 0x188   :  { %1399 = vmatpush1.bf16.msra.mxu0 %v1954_v56 }
 0x189   :  { %v2010_v63 = vpop.eup %2009  ;;  %1411 = vmatprep.subr.bf16.mxu0 %v1959_v57 }
 0x18a   :  { %v2012_v0 = vpop.eup %2011  ;;  %765 = vmatprep.mubr.f32.mxu1 %v2010_v63  ;;  %v794_v63 = vrot.slane %v777_v58, %v2613_v42 }
 0x18b   :  { %766 = vmatmul.mubr.f32.vlgmr.msra.gmra.mrb[8].mxu1 %v2012_v0  ;;  %v798_v0 = vrot.slane %v777_v58, %v2617_v53 }
 0x21e   :  { %v1687_v17 = vpop.f32.mrb[0].mxu0 }
 0x21f   :  { %v1688_v18 = vpop.f32.mrb[1].mxu0 }
 0x220   :  { %v1689_v19 = vadd.f32 %v1688_v18, %v1687_v17 }
 0x222   :  { %v698_v23 = vadd.f32 %v1689_v19, %v1580_v20 }
 0x25e   :  { %v1722_v21 = vpop.f32.mrb[8].mxu1 }
 0x25f   :  { %v1723_v22 = vpop.f32.mrb[9].mxu1 }
 0x260   :  { %v1724_v24 = vadd.f32 %v1723_v22, %v1722_v21 }
 0x262   :  { %v768_v25 = vadd.f32 %v1724_v24, %v698_v23 }
 0x264   :  { %v771_v26 = vmul.f32 1.442695, %v768_v25  ;;  %783 = vperm.xlu1 %1807, %v768_v25  }
 0x266   :  { %2013 = vpow2.f32 %v771_v26 }
 0x268   :  { %1808 = vset.pattern.permute.xlu1 %v2110_v29 }
 0x269   :  { %837 = vperm.xlu1 %1808, %v768_v25  }
 0x26d   :  { %1810 = vset.pattern.permute.xlu1 %v2109_v2  ;;  %v844_v2 = vrot.slane %v1581_v60, %v2608_v40 }
 0x270   :  { %v2014_v37 = vpop.eup %2013 }
 0x271   :  { %v774_v39 = vsel %vm773_vm0, %v768_v25, %v2014_v37  ;;  %v918_v41 = vmul.f32 %v2014_v37, %v916_v30  ;;  %v874_v43 = vmul.f32 %v2014_v37, %v872_v36 }
 0x272   :  { %776 = vst.msk [vmem:[%s2674_s10] sm:$0xff] %vm775_vm1, %v774_v39 }
 0x273   :  { %921 = vperm.xlu0 %1809, %v918_v41   ;;  %877 = vperm.xlu1 %1810, %v874_v43  }
 0x277   :  { %1812 = vset.pattern.permute.xlu0 %v2111_v46  ;;  %1811 = vset.pattern.permute.xlu1 %v2111_v46 }
 0x278   :  { %889 = vperm.xlu0 %1812, %v874_v43   ;;  %933 = vperm.xlu1 %1811, %v918_v41  }
 0x2e3   :  { %v784_v59 = vpop.permute.xlu1 %783 }
 0x2e4   :  { %v807_v11 = vmul.f32 %v790_v62, %v784_v59  ;;  %v808_v12 = vmul.f32 %v794_v63, %v784_v59  ;;  %v809_v13 = vmul.f32 %v798_v0, %v784_v59  ;;  %v810_v14 = vmul.f32 %v802_v1, %v784_v59 }
 0x2e6   :  { %v832_v19 = vadd.f32 %v815_v6, %v807_v11  ;;  %v833_v20 = vadd.f32 %v819_v7, %v808_v12  ;;  %v834_v21 = vadd.f32 %v823_v8, %v809_v13  ;;  %v835_v22 = vadd.f32 %v827_v9, %v810_v14 }
 0x2e8   :  { %v838_v10 = vpop.permute.xlu1 %837 }
 0x2e9   :  { %v861_v15 = vmul.f32 %v844_v2, %v838_v10  ;;  %v862_v16 = vmul.f32 %v848_v3, %v838_v10  ;;  %v863_v17 = vmul.f32 %v852_v4, %v838_v10  ;;  %v864_v18 = vmul.f32 %v856_v5, %v838_v10 }
 0x2eb   :  { %v865_v23 = vadd.f32 %v861_v15, %v832_v19  ;;  %v866_v24 = vadd.f32 %v862_v16, %v833_v20  ;;  %v867_v25 = vadd.f32 %v863_v17, %v834_v21  ;;  %v868_v26 = vadd.f32 %v864_v18, %v835_v22  ;;  %v1957_v21 = vld [vmem:[#allocation6 + $0x100] ss:$8 sps:$4 sm:$0xff]  }
 0x2f2   :  { %v922_v53 = vpop.permute.xlu0 %921  ;;  %v878_v27 = vpop.permute.xlu1 %877 }
 0x2f3   :  { %v924_v54 = vmul.f32 %v922_v53, %v790_v62  ;;  %v925_v28 = vmul.f32 %v922_v53, %v794_v63  ;;  %v926_v29 = vmul.f32 %v922_v53, %v798_v0  ;;  %v927_v30 = vmul.f32 %v922_v53, %v802_v1  ;;  %v1965_v53 = vld [vmem:[#allocation6 + $0x124] ss:$8 sps:$4 sm:$0xff]  }
 0x2f4   :  { %v880_v31 = vmul.f32 %v878_v27, %v790_v62  ;;  %v881_v32 = vmul.f32 %v878_v27, %v794_v63  ;;  %v882_v33 = vmul.f32 %v878_v27, %v798_v0  ;;  %v883_v34 = vmul.f32 %v878_v27, %v802_v1  ;;  %v1963_v27 = vld [vmem:[#allocation6 + $0x120] ss:$8 sps:$4 sm:$0xff]  }
 0x2f5   :  { %v928_v35 = vadd.f32 %v924_v54, %v865_v23  ;;  %v929_v36 = vadd.f32 %v925_v28, %v866_v24  ;;  %v930_v37 = vadd.f32 %v926_v29, %v867_v25  ;;  %v931_v38 = vadd.f32 %v927_v30, %v868_v26  ;;  %v1968_v54 = vld [vmem:[#allocation6 + $0x134] ss:$8 sps:$4 sm:$0xff]   ;;  %v1966_v28 = vld [vmem:[#allocation6 + $0x130] ss:$8 sps:$4 sm:$0xff]   ;;  %v1971_v29 = vld [vmem:[#allocation6 + $0x144] ss:$8 sps:$4 sm:$0xff]  }
 0x2f6   :  { %v884_v41 = vadd.f32 %v880_v31, %v865_v23  ;;  %v885_v43 = vadd.f32 %v881_v32, %v866_v24  ;;  %v886_v44 = vadd.f32 %v882_v33, %v867_v25  ;;  %v887_v45 = vadd.f32 %v883_v34, %v868_v26  ;;  %v1962_v24 = vld [vmem:[#allocation6 + $0x114] ss:$8 sps:$4 sm:$0xff]   ;;  %v1960_v26 = vld [vmem:[#allocation6 + $0x110] ss:$8 sps:$4 sm:$0xff]   ;;  %v1969_v30 = vld [vmem:[#allocation6 + $0x140] ss:$8 sps:$4 sm:$0xff]  }
 0x2f7   :  { %v890_v39 = vpop.permute.xlu0 %889  ;;  %v934_v46 = vpop.permute.xlu1 %933  ;;  %v1974_v31 = vld [vmem:[#allocation6 + $0x154] ss:$8 sps:$4 sm:$0xff]   ;;  %v1972_v32 = vld [vmem:[#allocation6 + $0x150] ss:$8 sps:$4 sm:$0xff]   ;;  %v1977_v33 = vld [vmem:[#allocation6 + $0x164] ss:$8 sps:$4 sm:$0xff]  }
 0x2f8   :  { %v892_v47 = vmul.f32 %v890_v39, %v844_v2  ;;  %v893_v48 = vmul.f32 %v890_v39, %v848_v3  ;;  %v894_v49 = vmul.f32 %v890_v39, %v852_v4  ;;  %v895_v50 = vmul.f32 %v890_v39, %v856_v5  ;;  %v1975_v34 = vld [vmem:[#allocation6 + $0x160] ss:$8 sps:$4 sm:$0xff]   ;;  %v1986_v39 = vld [vmem:[#allocation6 + $0x194] ss:$8 sps:$4 sm:$0xff]  }
 0x2f9   :  { %v936_v51 = vmul.f32 %v934_v46, %v844_v2  ;;  %v937_v52 = vmul.f32 %v934_v46, %v848_v3  ;;  %v938_v55 = vmul.f32 %v934_v46, %v852_v4  ;;  %v939_v56 = vmul.f32 %v934_v46, %v856_v5  ;;  %v1990_v46 = vld [vmem:[#allocation6 + $0x1b0] ss:$8 sps:$4 sm:$0xff]  }
 0x2fa   :  { %v896_v57 = vadd.f32 %v892_v47, %v884_v41  ;;  %v897_v58 = vadd.f32 %v893_v48, %v885_v43  ;;  %v898_v59 = vadd.f32 %v894_v49, %v886_v44  ;;  %v899_v60 = vadd.f32 %v895_v50, %v887_v45  ;;  %v1984_v41 = vld [vmem:[#allocation6 + $0x190] ss:$8 sps:$4 sm:$0xff]   ;;  %v1989_v43 = vld [vmem:[#allocation6 + $0x1a4] ss:$8 sps:$4 sm:$0xff]   ;;  %v1987_v44 = vld [vmem:[#allocation6 + $0x1a0] ss:$8 sps:$4 sm:$0xff]  }
 0x2fb   :  { %v940_v61 = vadd.f32 %v936_v51, %v928_v35  ;;  %v941_v62 = vadd.f32 %v937_v52, %v929_v36  ;;  %v942_v63 = vadd.f32 %v938_v55, %v930_v37  ;;  %v943_v0 = vadd.f32 %v939_v56, %v931_v38  ;;  %v1980_v35 = vld [vmem:[#allocation6 + $0x174] ss:$8 sps:$4 sm:$0xff]   ;;  %v1978_v36 = vld [vmem:[#allocation6 + $0x170] ss:$8 sps:$4 sm:$0xff]   ;;  %v1983_v37 = vld [vmem:[#allocation6 + $0x184] ss:$8 sps:$4 sm:$0xff]  }
 0x2fc   :  { %v900_v1 = vmax.f32 %v896_v57, 0.0  ;;  %v901_v6 = vmax.f32 %v897_v58, 0.0  ;;  %v902_v7 = vmax.f32 %v898_v59, 0.0  ;;  %v903_v8 = vmax.f32 %v899_v60, 0.0  ;;  %v1981_v38 = vld [vmem:[#allocation6 + $0x180] ss:$8 sps:$4 sm:$0xff]  }
 0x2fd   :  { %v944_v9 = vmax.f32 %v940_v61, 0.0  ;;  %v945_v10 = vmax.f32 %v941_v62, 0.0  ;;  %v946_v11 = vmax.f32 %v942_v63, 0.0  ;;  %v947_v12 = vmax.f32 %v943_v0, 0.0  ;;  %v1992_v45 = vld [vmem:[#allocation6 + $0x1b4] ss:$8 sps:$4 sm:$0xff]  }
 0x2fe   :  { %v904_v2 = vpack.c.bf16 %v900_v1, %v900_v1  ;;  %v905_v3 = vpack.c.bf16 %v901_v6, %v901_v6  ;;  %v906_v4 = vpack.c.bf16 %v902_v7, %v902_v7  ;;  %v907_v5 = vpack.c.bf16 %v903_v8, %v903_v8  ;;  %v1995_v47 = vld [vmem:[#allocation6 + $0x1c4] ss:$8 sps:$4 sm:$0xff]   ;;  %v1993_v48 = vld [vmem:[#allocation6 + $0x1c0] ss:$8 sps:$4 sm:$0xff]   ;;  %v1998_v49 = vld [vmem:[#allocation6 + $0x1d4] ss:$8 sps:$4 sm:$0xff]  }
 0x2ff   :  { %v948_v13 = vpack.c.bf16 %v944_v9, %v944_v9  ;;  %v949_v14 = vpack.c.bf16 %v945_v10, %v945_v10  ;;  %v950_v15 = vpack.c.bf16 %v946_v11, %v946_v11  ;;  %v951_v16 = vpack.c.bf16 %v947_v12, %v947_v12  ;;  %v1996_v50 = vld [vmem:[#allocation6 + $0x1d0] ss:$8 sps:$4 sm:$0xff]   ;;  %v2001_v51 = vld [vmem:[#allocation6 + $0x1e4] ss:$8 sps:$4 sm:$0xff]   ;;  %v1999_v52 = vld [vmem:[#allocation6 + $0x1e0] ss:$8 sps:$4 sm:$0xff]  }
 0x300   :  { %908 = vst [vmem:[#allocation2] sm:$0xf] %v904_v2  ;;  %909 = vst [vmem:[#allocation2 + $0x8] sm:$0xf] %v905_v3  ;;  %v2004_v55 = vld [vmem:[#allocation6 + $0x1f4] ss:$8 sps:$4 sm:$0xff]  }
 0x301   :  { %910 = vst [vmem:[#allocation2 + $0x10] sm:$0xf] %v906_v4  ;;  %911 = vst [vmem:[#allocation2 + $0x18] sm:$0xf] %v907_v5  ;;  %v956_v17 = vrot.slane %v948_v13, 4  ;;  %v957_v18 = vrot.slane %v949_v14, 4 }
 0x302   :  { %v958_v19 = vrot.slane %v950_v15, 4  ;;  %v959_v20 = vrot.slane %v951_v16, 4  ;;  %v2002_v56 = vld [vmem:[#allocation6 + $0x1f0] ss:$8 sps:$4 sm:$0xff]   ;;  %v1036_v58 = vld [vmem:[%s2672_s8] sm:$0x3] }
 0x303   :  { %964 = vst [vmem:[#allocation2] sm:$0xf0] %v956_v17  ;;  %965 = vst [vmem:[#allocation2 + $0x8] sm:$0xf0] %v957_v18  ;;  %v1041_v59 = vrot.slane %v1036_v58, %v2608_v40  ;;  %v1045_v60 = vrot.slane %v1036_v58, %v2613_v42  ;;  %s2112_s8 = smov [#allocation8]  }
 0x304   :  { %966 = vst [vmem:[#allocation2 + $0x10] sm:$0xf0] %v958_v19  ;;  %967 = vst [vmem:[#allocation2 + $0x18] sm:$0xf0] %v959_v20  ;;  %s1504_s12 = sshll.u32 %s2112_s8, 4  ;;  %s1505_s12 = int_to_ptr.vmem [resolvable:$true] %s1504_s12 }
 0x305   :  { %s2075_s7 = scalar_lea.vmem %s1505_s12, 256  ;;  %p2080_p3 = scmp.lt.s32.totalorder %s1505_s12, %s1505_s12 }
 0x306   :  { %p2076_p2 = scmp.ne.s32.totalorder %s1505_s12, %s2075_s7  ;;  %p2081_p4 = scmp.lt.s32.totalorder %s2075_s7, %s2075_s7 }
 0x308   :  { %p2082_p5 = por %p2081_p4, %p2080_p3 }
 0x30a   :  { %v969_v22 = vld [vmem:[#allocation2 + $0x8] sm:$0xff]  ;;  %v968_v23 = vld [vmem:[#allocation2] sm:$0xff]  ;;  %p2083_p6 = pnand %p2082_p5, %p2076_p2 }
 0x30b   :  { %1400 = vmatprep.mubr.bf16.mxu0 %v969_v22  ;;  %v971_v25 = vld [vmem:[#allocation2 + $0x18] sm:$0xff]  ;;  %v970_v57 = vld [vmem:[#allocation2 + $0x10] sm:$0xff] }
 0x30c   :  { %1401 = vmatmul.mubr.bf16.vlgmr.msra.gmra.mrb[4].mxu0 %v968_v23 }
 0x30d   :  { %1412 = vmatpush1.bf16.msra.mxu0 %v1957_v21  ;;  %1443 = vmatprep.mubr.bf16.mxu0 %v971_v25 }
 0x30e   :  { %1413 = vmatprep.subr.bf16.mxu0 %v1962_v24 }
 0x311   :  { %1414 = vmatpush1.bf16.msra.mxu0 %v1960_v26 }
 0x312   :  { %1415 = vmatprep.subr.bf16.mxu0 %v1965_v53 }
 0x315   :  { %1416 = vmatpush1.bf16.msra.mxu0 %v1963_v27 }
 0x316   :  { %1417 = vmatprep.subr.bf16.mxu0 %v1968_v54 }
 0x319   :  { %1418 = vmatpush1.bf16.msra.mxu0 %v1966_v28 }
 0x31a   :  { %1419 = vmatprep.subr.bf16.mxu0 %v1971_v29 }
 0x31d   :  { %1420 = vmatpush1.bf16.msra.mxu0 %v1969_v30 }
 0x31e   :  { %1421 = vmatprep.subr.bf16.mxu0 %v1974_v31 }
 0x321   :  { %1422 = vmatpush1.bf16.msra.mxu0 %v1972_v32 }
 0x322   :  { %1423 = vmatprep.subr.bf16.mxu0 %v1977_v33 }
 0x325   :  { %1424 = vmatpush1.bf16.msra.mxu0 %v1975_v34 }
 0x326   :  { %1425 = vmatprep.subr.bf16.mxu0 %v1980_v35 }
 0x329   :  { %1426 = vmatpush1.bf16.msra.mxu0 %v1978_v36 }
 0x32a   :  { %1427 = vmatprep.subr.bf16.mxu0 %v1983_v37 }
 0x32d   :  { %1428 = vmatpush1.bf16.msra.mxu0 %v1981_v38 }
 0x32e   :  { %1429 = vmatprep.subr.bf16.mxu0 %v1986_v39 }
 0x331   :  { %1430 = vmatpush1.bf16.msra.mxu0 %v1984_v41 }
 0x332   :  { %1431 = vmatprep.subr.bf16.mxu0 %v1989_v43 }
 0x335   :  { %1432 = vmatpush1.bf16.msra.mxu0 %v1987_v44 }
 0x336   :  { %1433 = vmatprep.subr.bf16.mxu0 %v1992_v45 }
 0x339   :  { %1434 = vmatpush1.bf16.msra.mxu0 %v1990_v46 }
 0x33a   :  { %1435 = vmatprep.subr.bf16.mxu0 %v1995_v47 }
 0x33d   :  { %1436 = vmatpush1.bf16.msra.mxu0 %v1993_v48 }
 0x33e   :  { %1437 = vmatprep.subr.bf16.mxu0 %v1998_v49 }
 0x341   :  { %1438 = vmatpush1.bf16.msra.mxu0 %v1996_v50 }
 0x342   :  { %1439 = vmatprep.subr.bf16.mxu0 %v2001_v51 }
 0x345   :  { %1440 = vmatpush1.bf16.msra.mxu0 %v1999_v52 }
 0x346   :  { %1441 = vmatprep.subr.bf16.mxu0 %v2004_v55 }
 0x349   :  { %1442 = vmatpush1.bf16.msra.mxu0 %v2002_v56 }
 0x34c   :  { %1444 = vmatmul.mubr.bf16.vlgmr.msra.gmra.mrb[4].mxu0 %v970_v57 }
 0x41f   :  { %v1445_v61 = vpop.f32.mrb[4].mxu0 }
 0x420   :  { %v1789_v62 = vadd.f32 %v1445_v61, %v1041_v59  ;;  %v1447_v63 = vpop.f32.mrb[5].mxu0 }
 0x421   :  { %v1790_v0 = vadd.f32 %v1447_v63, %v1045_v60  ;;  %v1449_v1 = vpop.f32.mrb[6].mxu0 }
 0x422   :  { %v1647_v6 = vmul.f32 -1.442695, %v1789_v62  ;;  %v1791_v7 = vadd.f32 %v1449_v1, %v1041_v59  ;;  %v1451_v8 = vpop.f32.mrb[7].mxu0 }
 0x423   :  { %v1648_v9 = vmul.f32 -1.442695, %v1790_v0  ;;  %v1792_v10 = vadd.f32 %v1451_v8, %v1045_v60 }
 0x424   :  { %2015 = vpow2.f32 %v1647_v6  ;;  %v1650_v11 = vmul.f32 -1.442695, %v1791_v7 }
 0x425   :  { %2017 = vpow2.f32 %v1648_v9  ;;  %v1651_v12 = vmul.f32 -1.442695, %v1792_v10 }
 0x426   :  { %2019 = vpow2.f32 %v1650_v11 }
 0x427   :  { %2021 = vpow2.f32 %v1651_v12 }
 0x42e   :  { %v2016_v2 = vpop.eup %2015 }
 0x42f   :  { %v2018_v40 = vpop.eup %2017  ;;  %v1460_v3 = vadd.f32 1.0, %v2016_v2 }
 0x430   :  { %v2020_v42 = vpop.eup %2019  ;;  %v1461_v4 = vadd.f32 1.0, %v2018_v40 }
 0x431   :  { %v2022_v5 = vpop.eup %2021  ;;  %2023 = vrcp.f32 %v1460_v3  ;;  %v1481_v13 = vadd.f32 1.0, %v2020_v42 }
 0x432   :  { %2025 = vrcp.f32 %v1461_v4  ;;  %v1482_v14 = vadd.f32 1.0, %v2022_v5 }
 0x433   :  { %2027 = vrcp.f32 %v1481_v13 }
 0x434   :  { %2029 = vrcp.f32 %v1482_v14 }
 0x43b   :  { %v2024_v15 = vpop.eup %2023 }
 0x43c   :  { %v2026_v16 = vpop.eup %2025 }
 0x43d   :  { %v2028_v17 = vpop.eup %2027  ;;  %v1653_v18 = vpack.c.bf16 %v2026_v16, %v2024_v15 }
 0x43e   :  { %v2030_v19 = vpop.eup %2029 }
 0x43f   :  { %1474 = vst [vmem:[#allocation8] sm:$0xff] %v1653_v18  ;;  %v1654_v20 = vpack.c.bf16 %v2030_v19, %v2028_v17 }
 0x441   :  { %1495 = vst [vmem:[#allocation8 + $0x8] sm:$0xff] %v1654_v20 }
 0x442   :  { %2086 = shalt.err (!%p2083_p6)
}
 0x443   :  { %s2087_s14 = scalar_lea.hbm %s2675_s11, 256 }
 0x444   :  { %p2088_p7 = scmp.ne.s32.totalorder %s2675_s11, %s2087_s14  ;;  %p2091_p8 = scmp.lt.u32.totalorder %s2087_s14, %s2675_s11 }
 0x446   :  { %p2093_p9 = pnand %p2091_p8, %p2088_p7 }
 0x448   :  { %2096 = shalt.err (!%p2093_p9)
}
 0x449   :  { %1507 = dma.vmem_to_hbm [thread:$0]  %s1505_s12, 256, %s2675_s11, [#allocation5]  }
 0x44a   :  { %2101 = dma.done.wait [#allocation5], 256  }
 0x44b   :  { %2102 = vsyncadd [#allocation5], 4294967040 }
 0x44c   :  { %1513 = vsyncpa [#allocation4], 1 }
 0x44d   :  { %1514 = vsyncpa [#allocation7], 1 }
 0x44e   :  { %1515 = vsyncpa [#allocation5], 1 }

</bundles_post_ra>
